<compile_context>
chip_gen: v5e
topology: v5e:2x2
jax: 0.10.0
libtpu: 0.0.40
codegen_flags: <defaults>
</compile_context>

<pallas_src>
import functools

import jax
import jax.numpy as jnp
from jax import lax
from jax.experimental import pallas as pl
from jax.experimental.pallas import tpu as pltpu


def nerv_block_kernel(pos_ref, x_ref, w_ref, b_ref, o_ref, *, H, W):
    """One batch block of conv3x3(pad=1) + bias + SiLU, channels-on-sublanes.

    pos_ref: (2, L) int32        per-pixel (row, col) within its image
    x_ref  : (Cin_pad, L) f32    L = NB * H * W, lane-dense
    w_ref  : (Cout, 9*Cin_pad) bf16   row layout (ky*3+kx)*Cin_pad + cin
    b_ref  : (Cout, 1) f32
    o_ref  : (Cout, L)           conv output (pre-PixelShuffle), post-SiLU
    """
    L = x_ref.shape[1]
    x = x_ref[...]                       # (Cin_pad, L) f32
    row = pos_ref[0:1, :]                # (1, L) int32
    col = pos_ref[1:2, :]                # (1, L) int32

    # im2col patches for all 9 taps via static lane rolls + border masks.
    pieces = []
    for k in range(9):                   # static unroll over the 3x3 taps
        dy, dx = k // 3 - 1, k % 3 - 1
        shift = (-(dy * W + dx)) % L     # out[p] = x[p + dy*W + dx]
        shifted = pltpu.roll(x, shift, 1) if shift else x
        conds = []
        if dy < 0:
            conds.append(row >= -dy)
        if dy > 0:
            conds.append(row < H - dy)
        if dx < 0:
            conds.append(col >= -dx)
        if dx > 0:
            conds.append(col < W - dx)
        if conds:
            valid = conds[0]
            for c in conds[1:]:
                valid = valid & c
            shifted = jnp.where(valid, shifted, 0.0)
        pieces.append(shifted)
    patches = jnp.concatenate(pieces, axis=0)          # (9*Cin_pad, L) f32

    # Single fused MXU contraction: bf16 operands, f32 accumulation.
    acc = jnp.dot(w_ref[...], patches.astype(jnp.bfloat16),
                  preferred_element_type=jnp.float32)  # (Cout, L) f32

    # Epilogue in f32: one lane-broadcast bias add + SiLU (EUP sigmoid).
    acc = acc + b_ref[...]
    o_ref[...] = (acc * jax.nn.sigmoid(acc)).astype(o_ref.dtype)


def _pick_batch_block(n, hw):
    """Largest NB dividing n with a 128-aligned, modest lane width NB*hw."""
    nb = max(1, min(n, (2 << 20) // (256 * hw)))   # ~2 MiB of block data / step
    while nb > 1 and (n % nb or (nb * hw) % 128):
        nb -= 1
    if (nb * hw) % 128 and nb < n:
        nb = n        # fall back: one block spanning the whole batch axis
    return nb


@functools.partial(jax.jit, static_argnames=("stride",))
def nerv_block_forward(x_nchw, w_oihw, bias, *, stride):
    """NeRVBlock forward: conv3x3(pad=1) -> PixelShuffle(stride) -> Identity -> SiLU.

    x_nchw : (N, ngf, H, W) float32
    w_oihw : (new_ngf*stride**2, ngf, 3, 3) float32
    bias   : (new_ngf*stride**2,) float32
    returns: (N, new_ngf, H*stride, W*stride) NCHW, like the PyTorch module.
    """
    N, Cin, H, W = x_nchw.shape
    Cout = w_oihw.shape[0]
    HW = H * W

    # Pad Cin to a sublane multiple of 8 -> aligned in-kernel tap concatenation.
    Cpad = -(-Cin // 8) * 8

    # Lane-dense activation layout: (N, Cin, H, W) -> (Cpad, N*H*W).
    x_p = jnp.pad(x_nchw, ((0, 0), (0, Cpad - Cin), (0, 0), (0, 0)))
    x_flat = jnp.transpose(x_p, (1, 0, 2, 3)).reshape(Cpad, N * HW)

    # (Cout, Cin, 3, 3) -> (Cout, 9*Cpad), row = (ky*3+kx)*Cpad + cin; bf16 operand.
    w_p = jnp.pad(w_oihw, ((0, 0), (0, Cpad - Cin), (0, 0), (0, 0)))
    w9 = jnp.transpose(w_p, (0, 2, 3, 1)).reshape(Cout, 9 * Cpad).astype(jnp.bfloat16)
    b2 = bias.reshape(Cout, 1).astype(jnp.float32)

    # Per-pixel (row, col) within its image, used by the zero-padding masks.
    pix = jnp.arange(HW, dtype=jnp.int32)
    pos = jnp.tile(jnp.stack([pix // W, pix % W], axis=0), (1, N))   # (2, N*HW)

    NB = _pick_batch_block(N, HW)
    L = NB * HW
    grid = (N // NB,)

    # TODO(synk): at production NeRV resolutions add an H-tiling grid axis with
    # a 1-row halo instead of whole-image lane blocks, so VMEM blocks stay in
    # the few-MiB range on v7x's 64 MiB VMEM as well.
    conv_out = pl.pallas_call(
        functools.partial(nerv_block_kernel, H=H, W=W),
        out_shape=jax.ShapeDtypeStruct((Cout, N * HW), x_nchw.dtype),
        grid=grid,
        in_specs=[
            pl.BlockSpec((2, L), lambda i: (0, i)),            # pos
            pl.BlockSpec((Cpad, L), lambda i: (0, i)),         # x
            pl.BlockSpec((Cout, 9 * Cpad), lambda i: (0, 0)),  # weights (resident)
            pl.BlockSpec((Cout, 1), lambda i: (0, 0)),         # bias
        ],
        out_specs=pl.BlockSpec((Cout, L), lambda i: (0, i)),   # lane-dense output
        compiler_params=pltpu.CompilerParams(
            dimension_semantics=("parallel",),                 # independent batch blocks
            vmem_limit_bytes=32 * 1024 * 1024),
    )(pos, x_flat, w9, b2)

    # PixelShuffle(stride): out[n, c, h*r+i, w*r+j] = conv[n, c*r*r + i*r + j, h, w]
    r = stride
    new_ngf = Cout // (r * r)
    y = conv_out.reshape(Cout, N, H, W).transpose(1, 0, 2, 3)       # (N, Cout, H, W)
    y = y.reshape(N, new_ngf, r, r, H, W).transpose(0, 1, 4, 2, 5, 3)
    return y.reshape(N, new_ngf, H * r, W * r)


def reference_forward(x_nchw, w_oihw, bias, *, stride):
    """Plain-JAX reference matching the PyTorch module semantics."""
    y = lax.conv_general_dilated(
        x_nchw, w_oihw, window_strides=(1, 1), padding=((1, 1), (1, 1)),
        dimension_numbers=("NCHW", "OIHW", "NCHW"))
    y = y + bias[None, :, None, None]
    N, C, H, W = y.shape
    r = stride
    c = C // (r * r)
    y = y.reshape(N, c, r, r, H, W).transpose(0, 1, 4, 2, 5, 3)
    y = y.reshape(N, c, H * r, W * r)
    return y * jax.nn.sigmoid(y)   # SiLU after Identity norm


if __name__ == "__main__":
    # Module hyperparameters (small, consistent with the forward pass).
    ngf, new_ngf, stride = 4, 4, 2
    N, H, W = 2, 16, 16
    cout = new_ngf * stride * stride

    key = jax.random.PRNGKey(0)
    kx_, kw_, kb_ = jax.random.split(key, 3)
    x = jax.random.normal(kx_, (N, ngf, H, W), dtype=jnp.float32)
    w = 0.1 * jax.random.normal(kw_, (cout, ngf, 3, 3), dtype=jnp.float32)
    b = 0.1 * jax.random.normal(kb_, (cout,), dtype=jnp.float32)

    y = nerv_block_forward(x, w, b, stride=stride)
    y = jax.block_until_ready(y)
    assert y.shape == (N, new_ngf, H * stride, W * stride), y.shape

    # Loose check vs the full-f32 reference (kernel uses bf16 MXU operands).
    y_ref = reference_forward(x, w, b, stride=stride)
    err_f32 = float(jnp.max(jnp.abs(y - y_ref)))
    assert err_f32 < 3e-2, f"mismatch vs f32 reference: {err_f32}"

    # Tight check vs a reference fed the same bf16-rounded operands.
    xq = x.astype(jnp.bfloat16).astype(jnp.float32)
    wq = w.astype(jnp.bfloat16).astype(jnp.float32)
    y_ref_q = reference_forward(xq, wq, b, stride=stride)
    err_q = float(jnp.max(jnp.abs(y - y_ref_q)))
    assert err_q < 2e-3, f"mismatch vs bf16-rounded reference: {err_q}"

    print("KERNEL_OK")
</pallas_src>

<mosaic_0001>
module attributes {stable_mosaic.version = 11 : i64} {
  func.func @nerv_block_kernel(%arg0: i32, %arg1: memref<2x512xi32, #tpu.memory_space<vmem>>, %arg2: memref<8x512xf32, #tpu.memory_space<vmem>>, %arg3: memref<16x72xbf16, #tpu.memory_space<vmem>>, %arg4: memref<16x1xf32, #tpu.memory_space<vmem>>, %arg5: memref<16x512xf32, #tpu.memory_space<vmem>>) attributes {dimension_semantics = [#tpu.dimension_semantics<parallel>], iteration_bounds = array<i64: 1>, scalar_prefetch = 0 : i64, scratch_operands = 0 : i64, tpu.core_type = #tpu.core_type<tc>, window_params = [{transform_indices = @transform_0, window_bounds = array<i64: 2, 512>}, {transform_indices = @transform_1, window_bounds = array<i64: 8, 512>}, {pipeline_mode = #tpu.pipeline_mode<synchronous>, transform_indices = @transform_2, window_bounds = array<i64: 16, 72>}, {pipeline_mode = #tpu.pipeline_mode<synchronous>, transform_indices = @transform_3, window_bounds = array<i64: 16, 1>}, {transform_indices = @transform_4, window_bounds = array<i64: 16, 512>}]} {
    %c0 = arith.constant 0 : index
    %c0_0 = arith.constant 0 : index
    %0 = vector.load %arg2[%c0, %c0_0] : memref<8x512xf32, #tpu.memory_space<vmem>>, vector<8x512xf32>
    %c0_1 = arith.constant 0 : index
    %c0_2 = arith.constant 0 : index
    %1 = vector.load %arg1[%c0_1, %c0_2] : memref<2x512xi32, #tpu.memory_space<vmem>>, vector<1x512xi32>
    %c1 = arith.constant 1 : index
    %c0_3 = arith.constant 0 : index
    %2 = vector.load %arg1[%c1, %c0_3] : memref<2x512xi32, #tpu.memory_space<vmem>>, vector<1x512xi32>
    %c17_i32 = arith.constant 17 : i32
    %3 = tpu.dynamic_rotate %0 by %c17_i32 dim 1 : vector<8x512xf32>, i32 -> vector<8x512xf32>
    %c1_i32 = arith.constant 1 : i32
    %4 = vector.broadcast %c1_i32 : i32 to vector<1x512xi32>
    %5 = arith.cmpi sge, %1, %4 : vector<1x512xi32>
    %c1_i32_4 = arith.constant 1 : i32
    %6 = vector.broadcast %c1_i32_4 : i32 to vector<1x512xi32>
    %7 = arith.cmpi sge, %2, %6 : vector<1x512xi32>
    %8 = arith.andi %5, %7 : vector<1x512xi1>
    %cst = arith.constant 0.000000e+00 : f32
    %9 = vector.shape_cast %8 : vector<1x512xi1> to vector<1x512xi1>
    %10 = vector.broadcast %9 : vector<1x512xi1> to vector<8x512xi1>
    %11 = vector.broadcast %cst : f32 to vector<8x512xf32>
    %12 = arith.select %10, %3, %11 : vector<8x512xi1>, vector<8x512xf32>
    %c16_i32 = arith.constant 16 : i32
    %13 = tpu.dynamic_rotate %0 by %c16_i32 dim 1 : vector<8x512xf32>, i32 -> vector<8x512xf32>
    %c1_i32_5 = arith.constant 1 : i32
    %14 = vector.broadcast %c1_i32_5 : i32 to vector<1x512xi32>
    %15 = arith.cmpi sge, %1, %14 : vector<1x512xi32>
    %cst_6 = arith.constant 0.000000e+00 : f32
    %16 = vector.shape_cast %15 : vector<1x512xi1> to vector<1x512xi1>
    %17 = vector.broadcast %16 : vector<1x512xi1> to vector<8x512xi1>
    %18 = vector.broadcast %cst_6 : f32 to vector<8x512xf32>
    %19 = arith.select %17, %13, %18 : vector<8x512xi1>, vector<8x512xf32>
    %c15_i32 = arith.constant 15 : i32
    %20 = tpu.dynamic_rotate %0 by %c15_i32 dim 1 : vector<8x512xf32>, i32 -> vector<8x512xf32>
    %c1_i32_7 = arith.constant 1 : i32
    %21 = vector.broadcast %c1_i32_7 : i32 to vector<1x512xi32>
    %22 = arith.cmpi sge, %1, %21 : vector<1x512xi32>
    %c15_i32_8 = arith.constant 15 : i32
    %23 = vector.broadcast %c15_i32_8 : i32 to vector<1x512xi32>
    %24 = arith.cmpi slt, %2, %23 : vector<1x512xi32>
    %25 = arith.andi %22, %24 : vector<1x512xi1>
    %cst_9 = arith.constant 0.000000e+00 : f32
    %26 = vector.shape_cast %25 : vector<1x512xi1> to vector<1x512xi1>
    %27 = vector.broadcast %26 : vector<1x512xi1> to vector<8x512xi1>
    %28 = vector.broadcast %cst_9 : f32 to vector<8x512xf32>
    %29 = arith.select %27, %20, %28 : vector<8x512xi1>, vector<8x512xf32>
    %c1_i32_10 = arith.constant 1 : i32
    %30 = tpu.dynamic_rotate %0 by %c1_i32_10 dim 1 : vector<8x512xf32>, i32 -> vector<8x512xf32>
    %c1_i32_11 = arith.constant 1 : i32
    %31 = vector.broadcast %c1_i32_11 : i32 to vector<1x512xi32>
    %32 = arith.cmpi sge, %2, %31 : vector<1x512xi32>
    %cst_12 = arith.constant 0.000000e+00 : f32
    %33 = vector.shape_cast %32 : vector<1x512xi1> to vector<1x512xi1>
    %34 = vector.broadcast %33 : vector<1x512xi1> to vector<8x512xi1>
    %35 = vector.broadcast %cst_12 : f32 to vector<8x512xf32>
    %36 = arith.select %34, %30, %35 : vector<8x512xi1>, vector<8x512xf32>
    %c511_i32 = arith.constant 511 : i32
    %37 = tpu.dynamic_rotate %0 by %c511_i32 dim 1 : vector<8x512xf32>, i32 -> vector<8x512xf32>
    %c15_i32_13 = arith.constant 15 : i32
    %38 = vector.broadcast %c15_i32_13 : i32 to vector<1x512xi32>
    %39 = arith.cmpi slt, %2, %38 : vector<1x512xi32>
    %cst_14 = arith.constant 0.000000e+00 : f32
    %40 = vector.shape_cast %39 : vector<1x512xi1> to vector<1x512xi1>
    %41 = vector.broadcast %40 : vector<1x512xi1> to vector<8x512xi1>
    %42 = vector.broadcast %cst_14 : f32 to vector<8x512xf32>
    %43 = arith.select %41, %37, %42 : vector<8x512xi1>, vector<8x512xf32>
    %c497_i32 = arith.constant 497 : i32
    %44 = tpu.dynamic_rotate %0 by %c497_i32 dim 1 : vector<8x512xf32>, i32 -> vector<8x512xf32>
    %c15_i32_15 = arith.constant 15 : i32
    %45 = vector.broadcast %c15_i32_15 : i32 to vector<1x512xi32>
    %46 = arith.cmpi slt, %1, %45 : vector<1x512xi32>
    %c1_i32_16 = arith.constant 1 : i32
    %47 = vector.broadcast %c1_i32_16 : i32 to vector<1x512xi32>
    %48 = arith.cmpi sge, %2, %47 : vector<1x512xi32>
    %49 = arith.andi %46, %48 : vector<1x512xi1>
    %cst_17 = arith.constant 0.000000e+00 : f32
    %50 = vector.shape_cast %49 : vector<1x512xi1> to vector<1x512xi1>
    %51 = vector.broadcast %50 : vector<1x512xi1> to vector<8x512xi1>
    %52 = vector.broadcast %cst_17 : f32 to vector<8x512xf32>
    %53 = arith.select %51, %44, %52 : vector<8x512xi1>, vector<8x512xf32>
    %c496_i32 = arith.constant 496 : i32
    %54 = tpu.dynamic_rotate %0 by %c496_i32 dim 1 : vector<8x512xf32>, i32 -> vector<8x512xf32>
    %c15_i32_18 = arith.constant 15 : i32
    %55 = vector.broadcast %c15_i32_18 : i32 to vector<1x512xi32>
    %56 = arith.cmpi slt, %1, %55 : vector<1x512xi32>
    %cst_19 = arith.constant 0.000000e+00 : f32
    %57 = vector.shape_cast %56 : vector<1x512xi1> to vector<1x512xi1>
    %58 = vector.broadcast %57 : vector<1x512xi1> to vector<8x512xi1>
    %59 = vector.broadcast %cst_19 : f32 to vector<8x512xf32>
    %60 = arith.select %58, %54, %59 : vector<8x512xi1>, vector<8x512xf32>
    %c495_i32 = arith.constant 495 : i32
    %61 = tpu.dynamic_rotate %0 by %c495_i32 dim 1 : vector<8x512xf32>, i32 -> vector<8x512xf32>
    %c15_i32_20 = arith.constant 15 : i32
    %62 = vector.broadcast %c15_i32_20 : i32 to vector<1x512xi32>
    %63 = arith.cmpi slt, %1, %62 : vector<1x512xi32>
    %c15_i32_21 = arith.constant 15 : i32
    %64 = vector.broadcast %c15_i32_21 : i32 to vector<1x512xi32>
    %65 = arith.cmpi slt, %2, %64 : vector<1x512xi32>
    %66 = arith.andi %63, %65 : vector<1x512xi1>
    %cst_22 = arith.constant 0.000000e+00 : f32
    %67 = vector.shape_cast %66 : vector<1x512xi1> to vector<1x512xi1>
    %68 = vector.broadcast %67 : vector<1x512xi1> to vector<8x512xi1>
    %69 = vector.broadcast %cst_22 : f32 to vector<8x512xf32>
    %70 = arith.select %68, %61, %69 : vector<8x512xi1>, vector<8x512xf32>
    %71 = tpu.concatenate %12, %19, %29, %36, %0, %43, %53, %60, %70 in 0 : vector<8x512xf32>, vector<8x512xf32>, vector<8x512xf32>, vector<8x512xf32>, vector<8x512xf32>, vector<8x512xf32>, vector<8x512xf32>, vector<8x512xf32>, vector<8x512xf32> -> vector<72x512xf32>
    %c0_23 = arith.constant 0 : index
    %c0_24 = arith.constant 0 : index
    %72 = vector.load %arg3[%c0_23, %c0_24] : memref<16x72xbf16, #tpu.memory_space<vmem>>, vector<16x72xbf16>
    %73 = arith.truncf %71 : vector<72x512xf32> to vector<72x512xbf16>
    %cst_25 = arith.constant dense<0.000000e+00> : vector<16x512xf32>
    %74 = tpu.matmul %72, %73, %cst_25 {dimension_numbers = #tpu.dot_dimension_numbers<[1], [0], [0], [1], [0, 0, 1, 1], [], []>} : vector<16x72xbf16>, vector<72x512xbf16>, vector<16x512xf32> -> vector<16x512xf32>
    %c0_26 = arith.constant 0 : index
    %c0_27 = arith.constant 0 : index
    %75 = vector.load %arg4[%c0_26, %c0_27] : memref<16x1xf32, #tpu.memory_space<vmem>>, vector<16x1xf32>
    %76 = vector.broadcast %75 : vector<16x1xf32> to vector<16x512xf32>
    %77 = arith.addf %74, %76 : vector<16x512xf32>
    %78 = arith.negf %77 : vector<16x512xf32>
    %79 = math.exp %78 : vector<16x512xf32>
    %cst_28 = arith.constant 1.000000e+00 : f32
    %80 = vector.broadcast %cst_28 : f32 to vector<16x512xf32>
    %81 = arith.addf %80, %79 : vector<16x512xf32>
    %82 = arith.divf %80, %81 : vector<16x512xf32>
    %83 = arith.mulf %77, %82 : vector<16x512xf32>
    %c0_29 = arith.constant 0 : index
    %c0_30 = arith.constant 0 : index
    %84 = vector.load %arg5[%c0_29, %c0_30] : memref<16x512xf32, #tpu.memory_space<vmem>>, vector<16x512xf32>
    tpu.vector_store %arg5[%c0_29, %c0_30], %83 {strides = array<i32>} : memref<16x512xf32, #tpu.memory_space<vmem>>, vector<16x512xf32>,
    return
  }
  func.func @transform_0(%arg0: i32) -> (i32, i32) {
    %c0_i32 = arith.constant 0 : i32
    %c0_i32_0 = arith.constant 0 : i32
    return %c0_i32, %arg0 : i32, i32
  }
  func.func @transform_1(%arg0: i32) -> (i32, i32) {
    %c0_i32 = arith.constant 0 : i32
    %c0_i32_0 = arith.constant 0 : i32
    return %c0_i32, %arg0 : i32, i32
  }
  func.func @transform_2(%arg0: i32) -> (i32, i32) {
    %c0_i32 = arith.constant 0 : i32
    %c0_i32_0 = arith.constant 0 : i32
    %c0_i32_1 = arith.constant 0 : i32
    return %c0_i32, %c0_i32_0 : i32, i32
  }
  func.func @transform_3(%arg0: i32) -> (i32, i32) {
    %c0_i32 = arith.constant 0 : i32
    %c0_i32_0 = arith.constant 0 : i32
    %c0_i32_1 = arith.constant 0 : i32
    return %c0_i32, %c0_i32_0 : i32, i32
  }
  func.func @transform_4(%arg0: i32) -> (i32, i32) {
    %c0_i32 = arith.constant 0 : i32
    %c0_i32_0 = arith.constant 0 : i32
    return %c0_i32, %arg0 : i32, i32
  }
}

</mosaic_0001>

<bundles_post_ra>
// kernel: nerv_block_forward.1
= control target key start
LH: loop header
LB: loop body
LE: loop exit
PB: predicated region body
PF: predicated region fallthrough
CT: control target
= control target key end

     0   :  { %s703_s19 = smov 113   ;;  %s704_s20 = smov 111   ;;  %v711_v8 = vmov 0   ;;  %v33_v12 = vlaneseq  ;;  %v1370_v53 = vmov 0  ;;  %v1372_v54 = vmov 0  ;;  %s1342_s1 = inlined_call_operand.vmem [shape: f32[8,512], index: 1, kind: input, shape index: {}]   ;;  %s1343_s0 = inlined_call_operand.vmem [shape: s32[2,512], index: 0, kind: input, shape index: {}]   ;;  %s1344_s3 = inlined_call_operand.vmem [shape: f32[16,1], index: 3, kind: input, shape index: {}]   ;;  %s1345_s2 = inlined_call_operand.vmem [shape: bf16[16,72], index: 2, kind: input, shape index: {}]   ;;  %s1346_s4 = inlined_call_operand.vmem [shape: f32[16,512], index: 4, kind: output, shape index: {}]  }
   0x1   :  { %v741_v0 = vld [vmem:[%s1342_s1] sm:$0xff]  ;;  %v746_v1 = vld [vmem:[%s1342_s1 + $0x10] sm:$0xff]  ;;  %v753_v3 = vld [vmem:[%s1342_s1 + $0x8] sm:$0xff]  ;;  %s705_s25 = smov 112   ;;  %s706_s26 = smov 127   ;;  %668 = vset.pattern.permute.xlu1 %v711_v8  ;;  %669 = vset.pattern.permute.xlu2 %v711_v8  ;;  %v1374_v55 = vmov 0 }
   0x2   :  { %v613_v2 = vpack.i.bf16 %v746_v1, %v741_v0  ;;  %v758_v4 = vld [vmem:[%s1342_s1 + $0x18] sm:$0xff]  ;;  %v643_v6 = vpack.i.bf16 %v746_v1, %v753_v3  ;;  %s707_s27 = smov 15   ;;  %s708_s1 = smov 1   ;;  %670 = vset.pattern.permute.xlu0 %v711_v8  ;;  %v778_v9 = vld [vmem:[%s1343_s0] ss:$2 sm:$0xf] }
   0x3   :  { %v618_v5 = vpack.i.bf16 %v753_v3, %v758_v4  ;;  %v648_v7 = vpack.i.bf16 %v741_v0, %v758_v4  ;;  %s709_s28 = smov 17   ;;  %s710_s29 = smov 16   ;;  %v783_v10 = vld [vmem:[%s1343_s0 + $0x1] ss:$2 sm:$0xf]  ;;  %vm175_vm1 = vcmp.lt.s32.totalorder %v778_v9, 15 }
   0x4   :  { %614 = vrot.lane.b32.xlu1 %v613_v2, %s703_s19  ;;  %604 = vrot.lane.b32.xlu0 %v613_v2, %s704_s20  ;;  %vm1348_vm0 = vcmp.lt.s32.totalorder %v783_v10, 15  ;;  %vm1347_vm3 = vcmp.ge.s32.totalorder %v783_v10, 1  ;;  %v793_v15 = vand.u32 127, %v33_v12  ;;  %v203_v16 = vsel %vm175_vm1, 1, %v711_v8 }
   0x5   :  { %624 = vrot.lane.b32.xlu2 %v613_v2, %s705_s25  ;;  %vm229_vm2 = vmand %vm175_vm1, %vm1348_vm0  ;;  %v204_v24 = vperm.slane %v203_v16, 0  ;;  %v205_v34 = vperm.slane %v203_v16, 1  ;;  %v816_v35 = vsel %vm1348_vm0, 1, %v711_v8  ;;  %v206_v37 = vperm.slane %v203_v16, 2 }
   0x6   :  { %v230_v13 = vsel %vm229_vm2, 1, %v711_v8  ;;  %vm176_vm4 = vmand %vm175_vm1, %vm1347_vm3  ;;  %vm198_vm6 = vcmp.lt.s32.totalorder %v793_v15, 112  ;;  %v207_v39 = vperm.slane %v203_v16, 3  ;;  %v150_v45 = vperm.slane %v816_v35, 0 }
   0x7   :  { %v231_v17 = vperm.slane %v230_v13, 0  ;;  %v232_v18 = vperm.slane %v230_v13, 1  ;;  %v233_v19 = vperm.slane %v230_v13, 2  ;;  %v177_v20 = vsel %vm176_vm4, 1, %v711_v8 }
   0x8   :  { %v234_v23 = vperm.slane %v230_v13, 3  ;;  %v178_v28 = vperm.slane %v177_v20, 0  ;;  %v179_v33 = vperm.slane %v177_v20, 1  ;;  %v180_v36 = vperm.slane %v177_v20, 2 }
   0x9   :  { %vm801_vm7 = vcmp.eq.s32.totalorder %v231_v17, 1  ;;  %vm805_vm8 = vcmp.eq.s32.totalorder %v232_v18, 1  ;;  %vm809_vm9 = vcmp.eq.s32.totalorder %v233_v19, 1  ;;  %v181_v38 = vperm.slane %v177_v20, 3 }
   0xa   :  { %vm818_vm10 = vcmp.eq.s32.totalorder %v234_v23, 1  ;;  %vm827_vm12 = vcmp.eq.s32.totalorder %v204_v24, 1  ;;  %vm831_vm14 = vcmp.eq.s32.totalorder %v178_v28, 1  ;;  %v151_v46 = vperm.slane %v816_v35, 1 }
   0xb   :  { %vm841_vm15 = vcmp.eq.s32.totalorder %v179_v33, 1  ;;  %vm845_vm1 = vcmp.eq.s32.totalorder %v205_v34, 1  ;;  %vm859_vm2 = vcmp.eq.s32.totalorder %v180_v36, 1  ;;  %vm863_vm4 = vcmp.eq.s32.totalorder %v206_v37, 1 }
   0xc   :  { %619 = vrot.lane.b32.xlu1 %v618_v5, %s703_s19  ;;  %609 = vrot.lane.b32.xlu0 %v618_v5, %s704_s20  ;;  %v1371_v53 = vsel %vm863_vm4, 4294967295, %v1370_v53  ;;  %vm867_vm13 = vcmp.eq.s32.totalorder %v181_v38, 1  ;;  %vm871_vm3 = vcmp.eq.s32.totalorder %v207_v39, 1  ;;  %vm879_vm0 = vcmp.eq.s32.totalorder %v150_v45, 1 }
   0xd   :  { %629 = vrot.lane.b32.xlu2 %v618_v5, %s705_s25  ;;  %v1373_v54 = vsel %vm867_vm13, 4294967295, %v1372_v54  ;;  %v1375_v55 = vsel %vm871_vm3, 4294967295, %v1374_v55  ;;  %v1376_v60 = vmov 0  ;;  %vm883_vm5 = vcmp.eq.s32.totalorder %v151_v46, 1 }
   0xe   :  { %v1377_v60 = vsel %vm879_vm0, 4294967295, %v1376_v60  ;;  %v1378_v61 = vmov 0  ;;  %v152_v62 = vperm.slane %v816_v35, 2  ;;  %v153_v63 = vperm.slane %v816_v35, 3 }
   0xf   :  { %v1379_v61 = vsel %vm883_vm5, 4294967295, %v1378_v61  ;;  %vm1380_vm11 = vcmp.lt.s32.totalorder %v793_v15, 111  ;;  %vm1384_vm3 = vcmp.lt.s32.totalorder %v783_v10, 15  ;;  %vm1385_vm13 = vcmp.ge.s32.totalorder %v778_v9, 1 }
  0x10   :  { %vm96_vm4 = vmand %vm1385_vm13, %vm1384_vm3 }
  0x11   :  { %v920_v30 = vsel %vm96_vm4, 1, %v711_v8 }
  0x12   :  { %v101_v43 = vperm.slane %v920_v30, 3 }
  0x14   :  { %639 = vrot.lane.b32.xlu1 %v618_v5, %s706_s26  ;;  %634 = vrot.lane.b32.xlu0 %v613_v2, %s706_s26 }
  0x15   :  { %644 = vrot.lane.b32.xlu2 %v643_v6, %s707_s27 }
  0x1c   :  { %654 = vrot.lane.b32.xlu1 %v643_v6, %s708_s1  ;;  %649 = vrot.lane.b32.xlu0 %v648_v7, %s707_s27 }
  0x1d   :  { %116 = vrot.lane.b32.xlu2 %v758_v4, %s708_s1 }
  0x24   :  { %31 = vrot.lane.b32.xlu1 %v758_v4, %s709_s28  ;;  %659 = vrot.lane.b32.xlu0 %v643_v6, %s709_s28 }
  0x25   :  { %664 = vrot.lane.b32.xlu2 %v643_v6, %s710_s29 }
  0x2c   :  { %110 = vrot.lane.b32.xlu1 %v741_v0, %s708_s1  ;;  %62 = vrot.lane.b32.xlu0 %v758_v4, %s710_s29 }
  0x2d   :  { %25 = vrot.lane.b32.xlu2 %v741_v0, %s709_s28 }
  0x34   :  { %56 = vrot.lane.b32.xlu0 %v741_v0, %s710_s29 }
  0x5f   :  { %v625_v11 = vpop.permute.xlu2 %624 }
  0x60   :  { %v626_v21 = vunpack.i.l.bf16 %v625_v11  ;;  %v627_v25 = vunpack.i.h.bf16 %v625_v11 }
  0x67   :  { %v630_v14 = vpop.permute.xlu2 %629 }
  0x68   :  { %v632_v22 = vunpack.i.h.bf16 %v630_v14  ;;  %v631_v29 = vunpack.i.l.bf16 %v630_v14 }
  0x6a   :  { %v825_v41 = vsel %vm198_vm6, %v626_v21, %v632_v22  ;;  %v837_v44 = vsel %vm198_vm6, %v632_v22, %v627_v25  ;;  %v851_v49 = vsel %vm198_vm6, %v627_v25, %v631_v29  ;;  %v855_v50 = vsel %vm198_vm6, %v631_v29, %v626_v21  ;;  %vm1381_vm6 = vmmov %vm1380_vm11 }
  0x6b   :  { %vm1382_vm5 = vmmov %vm1381_vm6 }
  0x6c   :  { %vm1383_vm0 = vmmov %vm1382_vm5 }
  0x6f   :  { %v857_v51 = vpop.permute.xlu2 %644 }
  0x70   :  { %v647_v56 = vunpack.i.h.bf16 %v857_v51  ;;  %v646_v57 = vunpack.i.l.bf16 %v857_v51 }
  0x76   :  { %v797_v26 = vpop.permute.xlu1 %614  ;;  %v605_v27 = vpop.permute.xlu0 %604 }
  0x77   :  { %v607_v2 = vunpack.i.h.bf16 %v605_v27  ;;  %v606_v5 = vunpack.i.l.bf16 %v605_v27  ;;  %v617_v11 = vunpack.i.h.bf16 %v797_v26  ;;  %v616_v12 = vunpack.i.l.bf16 %v797_v26 }
  0x7e   :  { %v620_v58 = vpop.permute.xlu1 %619  ;;  %v610_v59 = vpop.permute.xlu0 %609 }
  0x7f   :  { %v612_v6 = vunpack.i.h.bf16 %v610_v59  ;;  %v611_v7 = vunpack.i.l.bf16 %v610_v59  ;;  %v622_v13 = vunpack.i.h.bf16 %v620_v58  ;;  %v621_v14 = vunpack.i.l.bf16 %v620_v58 }
  0x81   :  { %v227_v16 = vsel %vm1380_vm11, %v606_v5, %v612_v6  ;;  %v226_v17 = vsel %vm1381_vm6, %v612_v6, %v607_v2  ;;  %v225_v18 = vsel %vm1382_vm5, %v607_v2, %v611_v7  ;;  %v228_v19 = vsel %vm1383_vm0, %v611_v7, %v606_v5  ;;  %v955_v5 = vpop.permute.xlu2 %116 }
  0x82   :  { %v239_v20 = vsel %vm801_vm7, %v227_v16, 0.0  ;;  %v240_v21 = vsel %vm805_vm8, %v226_v17, 0.0  ;;  %v241_v22 = vsel %vm809_vm9, %v225_v18, 0.0  ;;  %v242_v23 = vsel %vm818_vm10, %v228_v19, 0.0 }
  0x83   :  { %v261_v24 = vpack.c.bf16 %v239_v20, %v239_v20  ;;  %v262_v25 = vpack.c.bf16 %v240_v21, %v240_v21  ;;  %v263_v26 = vpack.c.bf16 %v241_v22, %v241_v22  ;;  %v264_v27 = vpack.c.bf16 %v242_v23, %v242_v23 }
  0x84   :  { %vm1386_vm0 = vcmp.lt.s32.totalorder %v793_v15, 113  ;;  %vm1388_vm7 = vcmp.ge.s32.totalorder %v783_v10, 1  ;;  %vm1389_vm8 = vcmask 1043456   ;;  %vm1394_vm6 = vnez %v1371_v53 }
  0x85   :  { %v173_v28 = vsel %vm1386_vm0, %v616_v12, %v622_v13  ;;  %vm1387_vm5 = vmmov %vm1386_vm0  ;;  %v925_v31 = vsel %vm1388_vm7, 1, %v711_v8  ;;  %v288_v32 = vsel %vm1389_vm8, %v261_v24, 0  ;;  %vm943_vm7 = vcmp.eq.s32.totalorder %v152_v62, 1 }
  0x86   :  { %v172_v29 = vsel %vm1387_vm5, %v622_v13, %v617_v11  ;;  %vm1390_vm9 = vmmov %vm1389_vm8  ;;  %v640_v36 = vpop.permute.xlu1 %639  ;;  %v635_v37 = vpop.permute.xlu0 %634  ;;  %302 = vmatpush.bf16.msra.mxu0 %v288_v32  ;;  %v533_v62 = vpack.c.bf16 %v825_v41, %v173_v28  ;;  %v1403_v6 = vmov 0  ;;  %v100_v7 = vperm.slane %v920_v30, 2 }
  0x87   :  { %v291_v33 = vsel %vm1390_vm9, %v262_v25, 0  ;;  %vm1391_vm10 = vmmov %vm1389_vm8  ;;  %v642_v46 = vunpack.i.h.bf16 %v640_v36  ;;  %v641_v58 = vunpack.i.l.bf16 %v640_v36  ;;  %v637_v59 = vunpack.i.h.bf16 %v635_v37 }
  0x88   :  { %v294_v34 = vsel %vm1391_vm10, %v263_v26, 0  ;;  %vm1392_vm11 = vmmov %vm1389_vm8  ;;  %316 = vmatpush.bf16.msra.mxu1 %v291_v33  ;;  %vm947_vm8 = vcmp.eq.s32.totalorder %v153_v63, 1  ;;  %v636_v2 = vunpack.i.l.bf16 %v635_v37  ;;  %vm1400_vm9 = vnez %v1373_v54 }
  0x89   :  { %v297_v35 = vsel %vm1392_vm11, %v264_v27, 0  ;;  %vm1393_vm4 = vmmov %vm1386_vm0  ;;  %330 = vmatpush.bf16.msra.mxu2 %v294_v34  ;;  %vm1401_vm10 = vnez %v1375_v55  ;;  %v546_v63 = vpack.c.bf16 %v837_v44, %v172_v29  ;;  %vm1405_vm11 = vcmp.lt.s32.totalorder %v793_v15, 127  ;;  %v1105_v25 = vpop.permute.xlu2 %664 }
  0x8a   :  { %v171_v38 = vsel %vm1393_vm4, %v617_v11, %v621_v14  ;;  %vm1395_vm5 = vmmov %vm1386_vm0  ;;  %344 = vmatpush.bf16.msra.mxu3 %v297_v35  ;;  %vm712_vm4 = vmmov 1   ;;  %v126_v11 = vperm.slane %v925_v31, 2  ;;  %v147_v41 = vsel %vm1405_vm11, %v636_v2, %v642_v46 }
  0x8b   :  { %v174_v39 = vsel %vm1395_vm5, %v621_v14, %v616_v12  ;;  %vm1402_vm5 = vnez %v1377_v60  ;;  %v559_v12 = vpack.c.bf16 %v851_v49, %v171_v38  ;;  %vm1406_vm13 = vmmov %vm1405_vm11  ;;  %v1408_v60 = vmov 0 }
  0x8c   :  { %vm962_vm0 = vmpackc.low %vm1402_vm5, %vm712_vm4  ;;  %v572_v13 = vpack.c.bf16 %v855_v50, %v174_v39  ;;  %v146_v44 = vsel %vm1406_vm13, %v642_v46, %v637_v59  ;;  %vm1407_vm5 = vnez %v1379_v61  ;;  %v145_v49 = vsel %vm1406_vm13, %v637_v59, %v641_v58 }
  0x8d   :  { %v1404_v6 = vsel %vm962_vm0, 4294967295, %v1403_v6  ;;  %vm977_vm3 = vmpackc.low %vm1407_vm5, %vm712_vm4  ;;  %v127_v48 = vperm.slane %v925_v31, 3  ;;  %v536_v53 = vpack.c.bf16 %v147_v41, %v741_v0  ;;  %v549_v52 = vpack.c.bf16 %v146_v44, %v753_v3  ;;  %v265_v3 = vld [vmem:[%s1344_s3] sm:$0xff] }
  0x8e   :  { %v1409_v60 = vsel %vm977_vm3, 4294967295, %v1408_v60  ;;  %vm1410_vm0 = vmpackc.low %vm827_vm12, %vm831_vm14  ;;  %v562_v55 = vpack.c.bf16 %v145_v49, %v746_v1  ;;  %v1049_v16 = vpop.permute.xlu1 %654  ;;  %v1051_v1 = vpop.permute.xlu0 %649  ;;  %269 = vperm.xlu1 %668, %v265_v3   ;;  %v667_v32 = vunpack.i.h.bf16 %v1105_v25  ;;  %v98_v37 = vperm.slane %v920_v30, 0 }
  0x8f   :  { %534 = vmatpush.bf16.msk.msra.mxu0 %vm1410_vm0, %v533_v62  ;;  %vm1411_vm11 = vmpackc.low %vm845_vm1, %vm841_vm15  ;;  %vm90_vm1 = vcmp.lt.s32.totalorder %v793_v15, 15  ;;  %v657_v20 = vunpack.i.h.bf16 %v1049_v16  ;;  %v656_v21 = vunpack.i.l.bf16 %v1049_v16  ;;  %v651_v22 = vunpack.i.l.bf16 %v1051_v1 }
  0x90   :  { %547 = vmatpush.bf16.msk.msra.mxu1 %vm1411_vm11, %v546_v63  ;;  %vm996_vm5 = vmpackc.low %vm943_vm7, %vm712_vm4  ;;  %vm1035_vm7 = vcmp.eq.s32.totalorder %v100_v7, 1  ;;  %vm1067_vm11 = vcmp.eq.s32.totalorder %v127_v48, 1  ;;  %v124_v45 = vperm.slane %v925_v31, 0  ;;  %v99_v46 = vperm.slane %v920_v30, 1  ;;  %v592_v30 = vld [vmem:[%s1345_s2] sm:$0xff] }
  0x91   :  { %vm1414_vm3 = vmmov %vm1406_vm13  ;;  %v91_v24 = vsel %vm90_vm1, %v647_v56, %v651_v22  ;;  %v652_v63 = vunpack.i.h.bf16 %v1051_v1  ;;  %v26_v14 = vpop.permute.xlu2 %25 }
  0x92   :  { %v148_v42 = vsel %vm1414_vm3, %v641_v58, %v636_v2  ;;  %vm1415_vm12 = vmpackc.low %vm1394_vm6, %vm859_vm2  ;;  %vm118_vm2 = vcmp.lt.s32.totalorder %v793_v15, 1  ;;  %vm1419_vm3 = vcmp.ge.s32.totalorder %v783_v10, 1  ;;  %vm1420_vm6 = vcmp.ge.s32.totalorder %v778_v9, 1  ;;  %v266_v10 = vld [vmem:[%s1344_s3 + $0x8] sm:$0xff] }
  0x93   :  { %560 = vmatpush.bf16.msk.msra.mxu2 %vm1415_vm12, %v559_v12  ;;  %vm1416_vm14 = vmpackc.low %vm1401_vm10, %vm1400_vm9  ;;  %v575_v61 = vpack.c.bf16 %v148_v42, %v758_v4  ;;  %vm1427_vm9 = vnez %v1404_v6  ;;  %vm1428_vm10 = vnez %v1409_v60  ;;  %v92_v4 = vsel %vm90_vm1, %v646_v57, %v647_v56  ;;  %274 = vperm.xlu2 %669, %v266_v10  }
  0x94   :  { %573 = vmatpush.bf16.msk.msra.mxu3 %vm1416_vm14, %v572_v13  ;;  %vm1017_vm15 = vmpackc.low %vm947_vm8, %vm712_vm4  ;;  %vm1039_vm8 = vcmp.eq.s32.totalorder %v126_v11, 1  ;;  %537 = vmatpush.bf16.msk.msra.mxu0 %vm1427_vm9, %v536_v53  ;;  %vm1063_vm4 = vcmp.eq.s32.totalorder %v101_v43, 1  ;;  %v120_v9 = vsel %vm118_vm2, %v656_v21, %v657_v20  ;;  %v666_v56 = vunpack.i.l.bf16 %v1105_v25 }
  0x95   :  { %vm1029_vm0 = vmand %vm1420_vm6, %vm1419_vm3  ;;  %550 = vmatpush.bf16.msk.msra.mxu1 %vm1428_vm10, %v549_v52  ;;  %v565_v26 = vpack.c.bf16 %v120_v9, %v92_v4  ;;  %vm64_vm14 = vcmp.lt.s32.totalorder %v793_v15, 16  ;;  %v125_v58 = vperm.slane %v925_v31, 1  ;;  %vm282_vm9 = vcmask 588800  }
  0x96   :  { %vm1433_vm13 = vmmov %vm1420_vm6  ;;  %v1086_v23 = vsel %vm1029_vm0, 1, %v711_v8  ;;  %v32_v33 = vpop.permute.xlu1 %31  ;;  %v660_v34 = vpop.permute.xlu0 %659  ;;  %v66_v40 = vsel %vm64_vm14, %v666_v56, %v667_v32  ;;  %vm1149_vm10 = vcmp.eq.s32.totalorder %v99_v46, 1  ;;  %v93_v49 = vsel %vm90_vm1, %v652_v63, %v646_v57 }
  0x97   :  { %v1074_v19 = vsel %vm1433_vm13, 1, %v711_v8  ;;  %563 = vmatpush.bf16.msk.msra.mxu2 %vm996_vm5, %v562_v55  ;;  %vm564_vm12 = vmpackc.low %vm1039_vm8, %vm1035_vm7  ;;  %v119_v8 = vsel %vm118_vm2, %v657_v20, %v955_v5  ;;  %v46_v28 = vperm.slane %v1086_v23, 2  ;;  %v662_v38 = vunpack.i.h.bf16 %v660_v34 }
  0x98   :  { %576 = vmatpush.bf16.msk.msra.mxu3 %vm1017_vm15, %v575_v61  ;;  %vm577_vm5 = vmpackc.low %vm1067_vm11, %vm1063_vm4  ;;  %v578_v27 = vpack.c.bf16 %v119_v8, %v91_v24  ;;  %v72_v29 = vperm.slane %v1074_v19, 2  ;;  %vm35_vm15 = vcmp.lt.s32.totalorder %v793_v15, 17  ;;  %v661_v39 = vunpack.i.l.bf16 %v660_v34 }
  0x99   :  { %vm1113_vm3 = vcmp.eq.s32.totalorder %v46_v28, 1  ;;  %v47_v2 = vperm.slane %v1086_v23, 3  ;;  %v73_v62 = vperm.slane %v1074_v19, 3  ;;  %vm1141_vm7 = vcmp.eq.s32.totalorder %v98_v37, 1 }
  0x9a   :  { %vm1117_vm6 = vcmp.eq.s32.totalorder %v72_v29, 1  ;;  %v37_v59 = vsel %vm35_vm15, %v661_v39, %v662_v38  ;;  %vm1145_vm8 = vcmp.eq.s32.totalorder %v124_v45, 1  ;;  %vm1153_vm4 = vcmp.eq.s32.totalorder %v125_v58, 1 }
  0x9b   :  { %566 = vmatpush.bf16.msk.msra.mxu2 %vm564_vm12, %v565_v26  ;;  %vm567_vm0 = vmpackc.low %vm1117_vm6, %vm1113_vm3  ;;  %v568_v6 = vpack.c.bf16 %v66_v40, %v37_v59  ;;  %vm1157_vm11 = vcmp.eq.s32.totalorder %v47_v2, 1  ;;  %vm1161_vm13 = vcmp.eq.s32.totalorder %v73_v62, 1  ;;  %v44_v44 = vperm.slane %v1086_v23, 0 }
  0x9c   :  { %579 = vmatpush.bf16.msk.msra.mxu3 %vm577_vm5, %v578_v27  ;;  %v94_v50 = vsel %vm90_vm1, %v651_v22, %v652_v63  ;;  %vm538_vm12 = vmpackc.low %vm1145_vm8, %vm1141_vm7  ;;  %v70_v43 = vperm.slane %v1074_v19, 0  ;;  %v45_v48 = vperm.slane %v1086_v23, 1  ;;  %v36_v57 = vsel %vm35_vm15, %v662_v38, %v32_v33 }
  0x9d   :  { %vm551_vm1 = vmpackc.low %vm1153_vm4, %vm1149_vm10  ;;  %vm1197_vm5 = vcmp.eq.s32.totalorder %v44_v44, 1  ;;  %v38_v3 = vsel %vm35_vm15, %v26_v14, %v661_v39  ;;  %v39_v10 = vsel %vm35_vm15, %v32_v33, %v26_v14 }
  0x9e   :  { %v111_v60 = vpop.permute.xlu1 %110  ;;  %v63_v42 = vpop.permute.xlu0 %62  ;;  %vm74_vm3 = vcmp.eq.s32.totalorder %v70_v43, 1  ;;  %vm49_vm6 = vcmp.eq.s32.totalorder %v45_v48, 1 }
  0x9f   :  { %569 = vmatpush.bf16.msk.msra.mxu2 %vm567_vm0, %v568_v6  ;;  %v121_v47 = vsel %vm118_vm2, %v111_v60, %v656_v21  ;;  %v122_v51 = vsel %vm118_vm2, %v955_v5, %v111_v60  ;;  %v65_v53 = vsel %vm64_vm14, %v667_v32, %v63_v42  ;;  %vm580_vm2 = vmpackc.low %vm1161_vm13, %vm1157_vm11  ;;  %v71_v5 = vperm.slane %v1074_v19, 1 }
  0xa0   :  { %v539_v52 = vpack.c.bf16 %v122_v51, %v94_v50  ;;  %v552_v54 = vpack.c.bf16 %v121_v47, %v93_v49  ;;  %v581_v55 = vpack.c.bf16 %v65_v53, %v36_v57  ;;  %vm541_vm7 = vmpackc.low %vm74_vm3, %vm1197_vm5 }
  0xa1   :  { %vm75_vm0 = vcmp.eq.s32.totalorder %v71_v5, 1 }
  0xa2   :  { %570 = vmatmul.msk.bf16.vlgmr.msra.gmra.mxu2 %vm282_vm9, %v592_v30  ;;  %540 = vmatpush.bf16.msk.msra.mxu0 %vm538_vm12, %v539_v52  ;;  %vm554_vm8 = vmpackc.low %vm75_vm0, %vm49_vm6 }
  0xa3   :  { %553 = vmatpush.bf16.msk.msra.mxu1 %vm551_vm1, %v552_v54  ;;  %582 = vmatpush.bf16.msk.msra.mxu3 %vm580_vm2, %v581_v55 }
  0xa6   :  { %583 = vmatmul.msk.bf16.vlgmr.msra.gmra.mxu3 %vm282_vm9, %v592_v30  ;;  %v57_v0 = vpop.permute.xlu0 %56 }
  0xa7   :  { %v67_v16 = vsel %vm64_vm14, %v57_v0, %v666_v56  ;;  %v68_v1 = vsel %vm64_vm14, %v63_v42, %v57_v0 }
  0xa8   :  { %v542_v4 = vpack.c.bf16 %v68_v1, %v39_v10  ;;  %v555_v17 = vpack.c.bf16 %v67_v16, %v38_v3 }
  0xaa   :  { %543 = vmatpush.bf16.msk.msra.mxu0 %vm541_vm7, %v542_v4  ;;  %556 = vmatpush.bf16.msk.msra.mxu1 %vm554_vm8, %v555_v17 }
  0xad   :  { %544 = vmatmul.msk.bf16.vlgmr.msra.gmra.mxu0 %vm282_vm9, %v592_v30  ;;  %557 = vmatmul.msk.bf16.vlgmr.msra.gmra.mxu1 %vm282_vm9, %v592_v30 }
  0xed   :  { %v275_v23 = vpop.permute.xlu2 %274 }
 0x100   :  { %v270_v18 = vpop.permute.xlu1 %269 }
 0x125   :  { %v336_v19 = vpop.f32.mrf.mxu2 }
 0x126   :  { %v1216_v20 = vadd.f32 %v336_v19, %v270_v18 }
 0x128   :  { %v586_v21 = vmul.f32 -1.442695, %v1216_v20 }
 0x129   :  { %v350_v22 = vpop.f32.mrf.mxu3 }
 0x12a   :  { %671 = vpow2.f32 %v586_v21  ;;  %v1219_v15 = vadd.f32 %v350_v22, %v270_v18  ;;  %v308_v9 = vpop.f32.mrf.mxu0  ;;  %v322_v24 = vpop.f32.mrf.mxu1 }
 0x12b   :  { %v1221_v8 = vadd.f32 %v308_v9, %v270_v18  ;;  %v1223_v25 = vadd.f32 %v322_v24, %v270_v18 }
 0x12c   :  { %v587_v27 = vmul.f32 -1.442695, %v1219_v15 }
 0x12d   :  { %v338_v26 = vpop.f32.mrf.mxu2  ;;  %v584_v32 = vmul.f32 -1.442695, %v1221_v8  ;;  %v585_v56 = vmul.f32 -1.442695, %v1223_v25 }
 0x12e   :  { %v1226_v28 = vadd.f32 %v338_v26, %v275_v23  ;;  %673 = vpow2.f32 %v587_v27 }
 0x12f   :  { %675 = vpow2.f32 %v584_v32 }
 0x130   :  { %v672_v29 = vpop.eup %671  ;;  %v590_v34 = vmul.f32 -1.442695, %v1226_v28 }
 0x131   :  { %v381_v33 = vadd.f32 1.0, %v672_v29  ;;  %v352_v35 = vpop.f32.mrf.mxu3 }
 0x132   :  { %v1231_v36 = vadd.f32 %v352_v35, %v275_v23  ;;  %v310_v37 = vpop.f32.mrf.mxu0  ;;  %v324_v62 = vpop.f32.mrf.mxu1 }
 0x133   :  { %677 = vrcp.f32 %v381_v33  ;;  %v1233_v38 = vadd.f32 %v310_v37, %v275_v23  ;;  %vm422_vm14 = vweird.f32 %v381_v33  ;;  %v426_v31 = vand.u32 2147483647, %v381_v33 }
 0x134   :  { %679 = vpow2.f32 %v585_v56  ;;  %v674_v39 = vpop.eup %673  ;;  %v591_v40 = vmul.f32 -1.442695, %v1231_v36  ;;  %v428_v7 = vand.u32 2147483648, %v381_v33  ;;  %v1245_v13 = vadd.f32 %v324_v62, %v275_v23 }
 0x135   :  { %681 = vpow2.f32 %v590_v34  ;;  %v676_v45 = vpop.eup %675  ;;  %v1236_v46 = vadd.f32 1.0, %v674_v39  ;;  %v588_v2 = vmul.f32 -1.442695, %v1233_v38  ;;  %vm1254_vm9 = vcmp.eq.f32.partialorder %v426_v31, 8.507059e+37 }
 0x136   :  { %v1238_v59 = vadd.f32 1.0, %v676_v45  ;;  %683 = vpow2.f32 %v591_v40  ;;  %v429_v57 = vor.u32 1.1754944e-38, %v428_v7  ;;  %v589_v53 = vmul.f32 -1.442695, %v1245_v13 }
 0x137   :  { %685 = vrcp.f32 %v1236_v46  ;;  %v441_v41 = vand.u32 2147483647, %v1236_v46  ;;  %v443_v44 = vand.u32 2147483648, %v1236_v46  ;;  %vm437_vm10 = vweird.f32 %v1236_v46 }
 0x138   :  { %687 = vrcp.f32 %v1238_v59  ;;  %v396_v50 = vand.u32 2147483647, %v1238_v59  ;;  %v398_v42 = vand.u32 2147483648, %v1238_v59  ;;  %vm392_vm13 = vweird.f32 %v1238_v59 }
 0x139   :  { %v678_v58 = vpop.eup %677  ;;  %689 = vpow2.f32 %v588_v2  ;;  %vm1264_vm11 = vcmp.eq.f32.partialorder %v441_v41, 8.507059e+37  ;;  %v444_v5 = vor.u32 1.1754944e-38, %v443_v44 }
 0x13a   :  { %v680_v63 = vpop.eup %679  ;;  %v418_v6 = vmul.f32 %v678_v58, %v381_v33  ;;  %vm423_vm15 = vweird.f32 %v678_v58  ;;  %vm1270_vm12 = vcmp.eq.f32.partialorder %v396_v50, 8.507059e+37  ;;  %v399_v3 = vor.u32 1.1754944e-38, %v398_v42 }
 0x13b   :  { %v682_v30 = vpop.eup %681  ;;  %v1243_v12 = vadd.f32 1.0, %v680_v63  ;;  %vm424_vm4 = vmor %vm422_vm14, %vm423_vm15 }
 0x13c   :  { %v419_v11 = vsub.f32 1.0, %v418_v6  ;;  %v1249_v60 = vadd.f32 1.0, %v682_v30  ;;  %v684_v43 = vpop.eup %683 }
 0x13d   :  { %691 = vrcp.f32 %v1243_v12  ;;  %v686_v47 = vpop.eup %685  ;;  %vm407_vm1 = vweird.f32 %v1243_v12  ;;  %v1277_v4 = vadd.f32 1.0, %v684_v43  ;;  %v411_v26 = vand.u32 2147483647, %v1243_v12 }
 0x13e   :  { %v420_v49 = vmul.f32 %v678_v58, %v419_v11  ;;  %693 = vrcp.f32 %v1249_v60  ;;  %v688_v52 = vpop.eup %687  ;;  %v433_v54 = vmul.f32 %v686_v47, %v1236_v46  ;;  %vm438_vm2 = vweird.f32 %v686_v47 }
 0x13f   :  { %v388_v14 = vmul.f32 %v688_v52, %v1238_v59  ;;  %v690_v10 = vpop.eup %689  ;;  %695 = vpow2.f32 %v589_v53  ;;  %vm393_vm5 = vweird.f32 %v688_v52  ;;  %v413_v32 = vand.u32 2147483648, %v1243_v12  ;;  %vm439_vm6 = vmor %vm437_vm10, %vm438_vm2 }
 0x140   :  { %v421_v51 = vadd.f32 %v678_v58, %v420_v49  ;;  %v434_v1 = vsub.f32 1.0, %v433_v54  ;;  %v1280_v21 = vadd.f32 1.0, %v690_v10  ;;  %697 = vrcp.f32 %v1277_v4  ;;  %vm394_vm0 = vmor %vm392_vm13, %vm393_vm5 }
 0x141   :  { %v389_v19 = vsub.f32 1.0, %v388_v14  ;;  %vm482_vm3 = vweird.f32 %v1249_v60  ;;  %v486_v34 = vand.u32 2147483647, %v1249_v60  ;;  %v488_v39 = vand.u32 2147483648, %v1249_v60 }
 0x142   :  { %v425_v61 = vsel %vm424_vm4, %v678_v58, %v421_v51  ;;  %v435_v23 = vmul.f32 %v686_v47, %v434_v1  ;;  %699 = vrcp.f32 %v1280_v21  ;;  %vm412_vm14 = vcmp.eq.f32.partialorder %v411_v26, 8.507059e+37 }
 0x143   :  { %v430_v16 = vsel %vm1254_vm9, %v429_v57, %v425_v61  ;;  %v692_v17 = vpop.eup %691  ;;  %v390_v24 = vmul.f32 %v688_v52, %v389_v19  ;;  %v414_v30 = vor.u32 1.1754944e-38, %v413_v32  ;;  %vm487_vm10 = vcmp.eq.f32.partialorder %v486_v34, 8.507059e+37 }
 0x144   :  { %v509_v18 = vmul.f32 %v430_v16, %v1216_v20  ;;  %v694_v22 = vpop.eup %693  ;;  %v403_v9 = vmul.f32 %v692_v17, %v1243_v12  ;;  %v436_v27 = vadd.f32 %v686_v47, %v435_v23  ;;  %vm408_vm7 = vweird.f32 %v692_v17 }
 0x145   :  { %v478_v20 = vmul.f32 %v694_v22, %v1249_v60  ;;  %v391_v56 = vadd.f32 %v688_v52, %v390_v24  ;;  %v696_v40 = vpop.eup %695  ;;  %vm483_vm8 = vweird.f32 %v694_v22  ;;  %vm409_vm15 = vmor %vm407_vm1, %vm408_vm7  ;;  %v501_v50 = vand.u32 2147483647, %v1277_v4 }
 0x146   :  { %517 = vst [vmem:[%s1346_s4 + $0x10] sm:$0xff] %v509_v18  ;;  %v404_v29 = vsub.f32 1.0, %v403_v9  ;;  %v440_v35 = vsel %vm439_vm6, %v686_v47, %v436_v27  ;;  %v698_v2 = vpop.eup %697  ;;  %vm484_vm9 = vmor %vm482_vm3, %vm483_vm8  ;;  %v384_v41 = vadd.f32 1.0, %v696_v40  ;;  %v503_v48 = vand.u32 2147483648, %v1277_v4 }
 0x147   :  { %v479_v33 = vsub.f32 1.0, %v478_v20  ;;  %v445_v45 = vsel %vm1264_vm11, %v444_v5, %v440_v35  ;;  %v395_v46 = vsel %vm394_vm0, %v688_v52, %v391_v56  ;;  %v493_v7 = vmul.f32 %v698_v2, %v1277_v4 }
 0x148   :  { %v405_v37 = vmul.f32 %v692_v17, %v404_v29  ;;  %v510_v62 = vmul.f32 %v445_v45, %v1219_v15  ;;  %v400_v63 = vsel %vm1270_vm12, %v399_v3, %v395_v46  ;;  %v489_v15 = vor.u32 1.1754944e-38, %v488_v39  ;;  %v700_v44 = vpop.eup %699 }
 0x149   :  { %v480_v58 = vmul.f32 %v694_v22, %v479_v33  ;;  %v507_v59 = vmul.f32 %v400_v63, %v1221_v8  ;;  %v494_v49 = vsub.f32 1.0, %v493_v7  ;;  %v448_v60 = vmul.f32 %v700_v44, %v1280_v21 }
 0x14a   :  { %v406_v6 = vadd.f32 %v692_v17, %v405_v37  ;;  %518 = vst [vmem:[%s1346_s4 + $0x18] sm:$0xff] %v510_v62  ;;  %vm498_vm4 = vweird.f32 %v698_v2  ;;  %701 = vrcp.f32 %v384_v41  ;;  %vm497_vm11 = vweird.f32 %v1277_v4 }
 0x14b   :  { %v481_v31 = vadd.f32 %v694_v22, %v480_v58  ;;  %515 = vst [vmem:[%s1346_s4] sm:$0xff] %v507_v59  ;;  %v495_v51 = vmul.f32 %v698_v2, %v494_v49  ;;  %v449_v57 = vsub.f32 1.0, %v448_v60  ;;  %v458_v53 = vand.u32 2147483648, %v1280_v21  ;;  %vm499_vm13 = vmor %vm497_vm11, %vm498_vm4 }
 0x14c   :  { %v410_v11 = vsel %vm409_vm15, %v692_v17, %v406_v6  ;;  %v504_v52 = vor.u32 1.1754944e-38, %v503_v48  ;;  %vm453_vm12 = vweird.f32 %v700_v44  ;;  %v456_v54 = vand.u32 2147483647, %v1280_v21 }
 0x14d   :  { %v415_v8 = vsel %vm412_vm14, %v414_v30, %v410_v11  ;;  %v485_v12 = vsel %vm484_vm9, %v694_v22, %v481_v31  ;;  %vm502_vm1 = vcmp.eq.f32.partialorder %v501_v50, 8.507059e+37  ;;  %vm452_vm2 = vweird.f32 %v1280_v21 }
 0x14e   :  { %v508_v42 = vmul.f32 %v415_v8, %v1223_v25  ;;  %v490_v43 = vsel %vm487_vm10, %v489_v15, %v485_v12  ;;  %v496_v25 = vadd.f32 %v698_v2, %v495_v51  ;;  %vm454_vm5 = vmor %vm452_vm2, %vm453_vm12  ;;  %v459_v3 = vor.u32 1.1754944e-38, %v458_v53 }
 0x14f   :  { %v513_v47 = vmul.f32 %v490_v43, %v1226_v28  ;;  %v450_v28 = vmul.f32 %v700_v44, %v449_v57  ;;  %vm457_vm3 = vcmp.eq.f32.partialorder %v456_v54, 8.507059e+37  ;;  %v473_v18 = vand.u32 2147483648, %v384_v41 }
 0x150   :  { %516 = vst [vmem:[%s1346_s4 + $0x8] sm:$0xff] %v508_v42  ;;  %v500_v55 = vsel %vm499_vm13, %v698_v2, %v496_v25  ;;  %v702_v14 = vpop.eup %701  ;;  %vm467_vm0 = vweird.f32 %v384_v41 }
 0x151   :  { %521 = vst [vmem:[%s1346_s4 + $0x30] sm:$0xff] %v513_v47  ;;  %v505_v5 = vsel %vm502_vm1, %v504_v52, %v500_v55  ;;  %v451_v61 = vadd.f32 %v700_v44, %v450_v28  ;;  %v463_v16 = vmul.f32 %v702_v14, %v384_v41  ;;  %vm468_vm6 = vweird.f32 %v702_v14 }
 0x152   :  { %v514_v0 = vmul.f32 %v505_v5, %v1231_v36  ;;  %v471_v36 = vand.u32 2147483647, %v384_v41  ;;  %vm469_vm7 = vmor %vm467_vm0, %vm468_vm6  ;;  %v474_v22 = vor.u32 1.1754944e-38, %v473_v18 }
 0x153   :  { %v455_v10 = vsel %vm454_vm5, %v700_v44, %v451_v61  ;;  %v464_v17 = vsub.f32 1.0, %v463_v16 }
 0x154   :  { %522 = vst [vmem:[%s1346_s4 + $0x38] sm:$0xff] %v514_v0  ;;  %v460_v1 = vsel %vm457_vm3, %v459_v3, %v455_v10  ;;  %vm472_vm8 = vcmp.eq.f32.partialorder %v471_v36, 8.507059e+37 }
 0x155   :  { %v511_v4 = vmul.f32 %v460_v1, %v1233_v38  ;;  %v465_v19 = vmul.f32 %v702_v14, %v464_v17 }
 0x157   :  { %519 = vst [vmem:[%s1346_s4 + $0x20] sm:$0xff] %v511_v4  ;;  %v466_v21 = vadd.f32 %v702_v14, %v465_v19 }
 0x159   :  { %v470_v23 = vsel %vm469_vm7, %v702_v14, %v466_v21 }
 0x15a   :  { %v475_v9 = vsel %vm472_vm8, %v474_v22, %v470_v23 }
 0x15b   :  { %v512_v24 = vmul.f32 %v475_v9, %v1245_v13 }
 0x15d   :  { %520 = vst [vmem:[%s1346_s4 + $0x28] sm:$0xff] %v512_v24 }

</bundles_post_ra>
